<compile_context>
chip_gen: v7x
topology: tpu7x:2x2x1
jax: 0.10.0
libtpu: 0.0.40
codegen_flags: <defaults>
</compile_context>

<pallas_src>
import functools

import jax
import jax.numpy as jnp
from jax import lax
from jax.experimental import pallas as pl
from jax.experimental.pallas import tpu as pltpu

EPS = 1e-5
DROP_P = 0.1
OUT_PAD = 128  # lane-dense output width (column 0 holds the real logit)


def _round_up(x, m):
    return (x + m - 1) // m * m


def _mlp_kernel(n_valid, x_ref, dm_ref, w1_ref, w2_ref, wo_ref, vec_ref,
                out_ref, stats_ref):
    phase = pl.program_id(0)
    tile = pl.program_id(1)
    tb = x_ref.shape[0]
    inv_n = jnp.float32(1.0 / n_valid)

    @pl.when(jnp.logical_and(phase == 0, tile == 0))
    def _():
        stats_ref[...] = jnp.zeros_like(stats_ref)

    b1, g1, be1 = vec_ref[0:1, :], vec_ref[1:2, :], vec_ref[2:3, :]
    b2, g2, be2 = vec_ref[3:4, :], vec_ref[4:5, :], vec_ref[5:6, :]
    bout = vec_ref[6:7, 0:1]

    # rows past the true batch size are zero padding; keep them out of the BN stats
    row = tile * tb + lax.broadcasted_iota(jnp.int32, (tb, 1), 0)
    valid = (row < n_valid).astype(jnp.float32)

    # layer_1 + relu (bf16 operands, f32 accumulate); recomputed each phase
    a1 = jnp.dot(x_ref[...], w1_ref[...], preferred_element_type=jnp.float32) + b1
    a1 = jnp.maximum(a1, 0.0)

    @pl.when(phase == 0)
    def _():
        m1 = valid * a1
        stats_ref[0:1, :] += jnp.sum(m1, axis=0, keepdims=True)
        stats_ref[1:2, :] += jnp.sum(m1 * a1, axis=0, keepdims=True)

    @pl.when(phase >= 1)
    def _():
        # batchnorm1 (training mode: batch mean, biased variance)
        mean1 = stats_ref[0:1, :] * inv_n
        var1 = jnp.maximum(stats_ref[1:2, :] * inv_n - mean1 * mean1, 0.0)
        h1 = (a1 - mean1) * lax.rsqrt(var1 + jnp.float32(EPS)) * g1 + be1

        # layer_2 + relu
        a2 = jnp.dot(h1.astype(jnp.bfloat16), w2_ref[...],
                     preferred_element_type=jnp.float32) + b2
        a2 = jnp.maximum(a2, 0.0)

        @pl.when(phase == 1)
        def _():
            m2 = valid * a2
            stats_ref[2:3, :] += jnp.sum(m2, axis=0, keepdims=True)
            stats_ref[3:4, :] += jnp.sum(m2 * a2, axis=0, keepdims=True)

        @pl.when(phase == 2)
        def _():
            # batchnorm2
            mean2 = stats_ref[2:3, :] * inv_n
            var2 = jnp.maximum(stats_ref[3:4, :] * inv_n - mean2 * mean2, 0.0)
            h2 = (a2 - mean2) * lax.rsqrt(var2 + jnp.float32(EPS)) * g2 + be2

            # dropout(p=0.1): precomputed multiplier in {0, 1/(1-p)}
            h2 = h2 * dm_ref[...]

            # layer_out into a lane-dense (tb, 128) slab (wout zero-padded to 128 cols)
            out = jnp.dot(h2.astype(jnp.bfloat16), wo_ref[...],
                          preferred_element_type=jnp.float32) + bout
            out_ref[...] = out


def _dropout_multiplier(seed, rows, cols):
    key = jax.random.PRNGKey(seed)
    u = jax.random.uniform(key, (rows, cols), jnp.float32)
    return jnp.where(u >= DROP_P, jnp.float32(1.0 / (1.0 - DROP_P)), jnp.float32(0.0))


def binary_classification_forward(x, params, seed=0, tile_b=1024):
    B, F = x.shape
    n = params["w1"].shape[1]

    tb = min(tile_b, _round_up(B, 8))          # batch tile (multiple of 8 sublanes)
    b_pad = _round_up(B, tb)
    n_tiles = b_pad // tb

    # pack / cast parameters (bf16 matmul operands; BN params stay f32)
    w1 = params["w1"].astype(jnp.bfloat16)
    w2 = params["w2"].astype(jnp.bfloat16)
    wout_pad = jnp.zeros((n, OUT_PAD), jnp.float32).at[:, 0:1].set(
        params["wout"]).astype(jnp.bfloat16)
    bout_row = jnp.zeros((1, n), jnp.float32).at[0, 0].set(params["bout"][0, 0])
    vecs = jnp.concatenate([params["b1"], params["g1"], params["be1"],
                            params["b2"], params["g2"], params["be2"],
                            bout_row], axis=0).astype(jnp.float32)

    x_p = jnp.pad(x.astype(jnp.bfloat16), ((0, b_pad - B), (0, 0)))
    dm = _dropout_multiplier(seed, b_pad, n)

    grid = (3, n_tiles)  # (phase, batch tile) — phases: BN1 stats, BN2 stats, output

    flops = 2 * b_pad * (3 * F * n + 2 * n * n + n * OUT_PAD)
    bytes_accessed = (3 * (x_p.size * 2 + dm.size * 4)
                      + w1.size * 2 + w2.size * 2 + wout_pad.size * 2
                      + vecs.size * 4 + b_pad * OUT_PAD * 4)

    out = pl.pallas_call(
        functools.partial(_mlp_kernel, B),
        out_shape=jax.ShapeDtypeStruct((b_pad, OUT_PAD), jnp.float32),
        grid=grid,
        in_specs=[
            pl.BlockSpec((tb, F), lambda p, t: (t, 0)),        # x (batch tiled)
            pl.BlockSpec((tb, n), lambda p, t: (t, 0)),        # dropout multiplier
            pl.BlockSpec((F, n), lambda p, t: (0, 0)),         # w1 (VMEM resident)
            pl.BlockSpec((n, n), lambda p, t: (0, 0)),         # w2 (VMEM resident)
            pl.BlockSpec((n, OUT_PAD), lambda p, t: (0, 0)),   # wout padded (resident)
            pl.BlockSpec((7, n), lambda p, t: (0, 0)),         # packed b/gamma/beta/bout
        ],
        out_specs=pl.BlockSpec((tb, OUT_PAD), lambda p, t: (t, 0)),
        scratch_shapes=[pltpu.VMEM((4, n), jnp.float32)],      # BN sum / sumsq accums
        compiler_params=pltpu.CompilerParams(
            # both axes carry cross-iteration state (whole-batch BN accumulators),
            # so they must stay "arbitrary"; megacore-parallel batch would need
            # per-core stat replication.
            dimension_semantics=("arbitrary", "arbitrary"),
            vmem_limit_bytes=32 * 1024 * 1024),
        cost_estimate=pl.CostEstimate(flops=flops, transcendentals=0,
                                      bytes_accessed=bytes_accessed),
    )(x_p, dm, w1, w2, wout_pad, vecs)

    return out[:B, 0:1]


def init_params(key, n_features, n_neurons):
    """PyTorch-style nn.Linear init: U(-1/sqrt(fan_in), 1/sqrt(fan_in))."""
    def linear(k, fan_in, fan_out):
        kw, kb = jax.random.split(k)
        bound = 1.0 / jnp.sqrt(jnp.float32(fan_in))
        w = jax.random.uniform(kw, (fan_in, fan_out), jnp.float32, -bound, bound)
        b = jax.random.uniform(kb, (1, fan_out), jnp.float32, -bound, bound)
        return w, b

    k1, k2, k3 = jax.random.split(key, 3)
    w1, b1 = linear(k1, n_features, n_neurons)
    w2, b2 = linear(k2, n_neurons, n_neurons)
    wout, bout = linear(k3, n_neurons, 1)
    return {
        "w1": w1, "b1": b1,
        "g1": jnp.ones((1, n_neurons), jnp.float32),
        "be1": jnp.zeros((1, n_neurons), jnp.float32),
        "w2": w2, "b2": b2,
        "g2": jnp.ones((1, n_neurons), jnp.float32),
        "be2": jnp.zeros((1, n_neurons), jnp.float32),
        "wout": wout, "bout": bout,
    }


def _reference_forward(x, params, dm):
    """Pure-JAX reference with the same bf16-matmul / f32-elementwise precision."""
    f32 = jnp.float32

    def bn_stats(a):
        mean = jnp.mean(a, axis=0, keepdims=True)
        var = jnp.maximum(jnp.mean(a * a, axis=0, keepdims=True) - mean * mean, 0.0)
        return mean, lax.rsqrt(var + f32(EPS))

    a1 = jax.nn.relu(jnp.dot(x.astype(jnp.bfloat16), params["w1"].astype(jnp.bfloat16),
                             preferred_element_type=f32) + params["b1"])
    m1, r1 = bn_stats(a1)
    h1 = (a1 - m1) * r1 * params["g1"] + params["be1"]
    a2 = jax.nn.relu(jnp.dot(h1.astype(jnp.bfloat16), params["w2"].astype(jnp.bfloat16),
                             preferred_element_type=f32) + params["b2"])
    m2, r2 = bn_stats(a2)
    h2 = (a2 - m2) * r2 * params["g2"] + params["be2"]
    h2 = h2 * dm[: x.shape[0]]
    return jnp.dot(h2.astype(jnp.bfloat16), params["wout"].astype(jnp.bfloat16),
                   preferred_element_type=f32) + params["bout"]


if __name__ == "__main__":
    B, N_FEATURES, N_NEURONS = 8, 16, 32

    key = jax.random.PRNGKey(0)
    kx, kp = jax.random.split(key)
    x = jax.random.normal(kx, (B, N_FEATURES), dtype=jnp.float32)
    params = init_params(kp, N_FEATURES, N_NEURONS)

    out = binary_classification_forward(x, params, seed=0)
    out = jax.block_until_ready(out)
    assert out.shape == (B, 1) and out.dtype == jnp.float32

    # cross-check against a pure-JAX reference using the same dropout multiplier
    tb = min(1024, _round_up(B, 8))
    b_pad = _round_up(B, tb)
    dm = _dropout_multiplier(0, b_pad, N_NEURONS)
    ref = _reference_forward(x, params, dm)
    assert bool(jnp.all(jnp.isfinite(out)))
    assert jnp.allclose(out, ref, rtol=5e-2, atol=5e-2)

    print("KERNEL_OK")
</pallas_src>

<mosaic_0001>
module attributes {stable_mosaic.version = 11 : i64} {
  func.func @_mlp_kernel(%arg0: i32, %arg1: i32, %arg2: memref<8x16xbf16, #tpu.memory_space<vmem>>, %arg3: memref<8x32xf32, #tpu.memory_space<vmem>>, %arg4: memref<16x32xbf16, #tpu.memory_space<vmem>>, %arg5: memref<32x32xbf16, #tpu.memory_space<vmem>>, %arg6: memref<32x128xbf16, #tpu.memory_space<vmem>>, %arg7: memref<7x32xf32, #tpu.memory_space<vmem>>, %arg8: memref<8x128xf32, #tpu.memory_space<vmem>>, %arg9: memref<4x32xf32, #tpu.memory_space<vmem>>) attributes {dimension_semantics = [#tpu.dimension_semantics<arbitrary>, #tpu.dimension_semantics<arbitrary>], iteration_bounds = array<i64: 3, 1>, scalar_prefetch = 0 : i64, scratch_operands = 1 : i64, tpu.core_type = #tpu.core_type<tc>, window_params = [{transform_indices = @transform_0, window_bounds = array<i64: 8, 16>}, {transform_indices = @transform_1, window_bounds = array<i64: 8, 32>}, {pipeline_mode = #tpu.pipeline_mode<synchronous>, transform_indices = @transform_2, window_bounds = array<i64: 16, 32>}, {pipeline_mode = #tpu.pipeline_mode<synchronous>, transform_indices = @transform_3, window_bounds = array<i64: 32, 32>}, {pipeline_mode = #tpu.pipeline_mode<synchronous>, transform_indices = @transform_4, window_bounds = array<i64: 32, 128>}, {pipeline_mode = #tpu.pipeline_mode<synchronous>, transform_indices = @transform_5, window_bounds = array<i64: 7, 32>}, {transform_indices = @transform_6, window_bounds = array<i64: 8, 128>}]} {
    %c0_i32 = arith.constant 0 : i32
    %0 = arith.cmpi eq, %arg0, %c0_i32 : i32
    %c0_i32_0 = arith.constant 0 : i32
    %1 = arith.cmpi eq, %arg1, %c0_i32_0 : i32
    %2 = arith.andi %0, %1 : i1
    %3 = arith.extui %2 : i1 to i32
    %c0_i32_1 = arith.constant 0 : i32
    %4 = arith.cmpi ne, %3, %c0_i32_1 : i32
    scf.if %4 {
      %cst_19 = arith.constant 0.000000e+00 : f32
      %33 = vector.broadcast %cst_19 : f32 to vector<4x32xf32>
      %c0_20 = arith.constant 0 : index
      %c0_21 = arith.constant 0 : index
      %34 = vector.load %arg9[%c0_20, %c0_21] : memref<4x32xf32, #tpu.memory_space<vmem>>, vector<4x32xf32>
      tpu.vector_store %arg9[%c0_20, %c0_21], %33 {strides = array<i32>} : memref<4x32xf32, #tpu.memory_space<vmem>>, vector<4x32xf32>,
    } else {
    }
    %c0 = arith.constant 0 : index
    %c0_2 = arith.constant 0 : index
    %5 = vector.load %arg7[%c0, %c0_2] : memref<7x32xf32, #tpu.memory_space<vmem>>, vector<1x32xf32>
    %c1 = arith.constant 1 : index
    %c0_3 = arith.constant 0 : index
    %6 = vector.load %arg7[%c1, %c0_3] : memref<7x32xf32, #tpu.memory_space<vmem>>, vector<1x32xf32>
    %c2 = arith.constant 2 : index
    %c0_4 = arith.constant 0 : index
    %7 = vector.load %arg7[%c2, %c0_4] : memref<7x32xf32, #tpu.memory_space<vmem>>, vector<1x32xf32>
    %c3 = arith.constant 3 : index
    %c0_5 = arith.constant 0 : index
    %8 = vector.load %arg7[%c3, %c0_5] : memref<7x32xf32, #tpu.memory_space<vmem>>, vector<1x32xf32>
    %c4 = arith.constant 4 : index
    %c0_6 = arith.constant 0 : index
    %9 = vector.load %arg7[%c4, %c0_6] : memref<7x32xf32, #tpu.memory_space<vmem>>, vector<1x32xf32>
    %c5 = arith.constant 5 : index
    %c0_7 = arith.constant 0 : index
    %10 = vector.load %arg7[%c5, %c0_7] : memref<7x32xf32, #tpu.memory_space<vmem>>, vector<1x32xf32>
    %c6 = arith.constant 6 : index
    %c0_8 = arith.constant 0 : index
    %11 = vector.load %arg7[%c6, %c0_8] : memref<7x32xf32, #tpu.memory_space<vmem>>, vector<1x1xf32>
    %c8_i32 = arith.constant 8 : i32
    %12 = arith.muli %arg1, %c8_i32 : i32
    %13 = tpu.iota {dimensions = array<i32: 0>} : vector<8x1xi32>
    %14 = vector.broadcast %12 : i32 to vector<8x1xi32>
    %15 = arith.addi %14, %13 : vector<8x1xi32>
    %c8_i32_9 = arith.constant 8 : i32
    %16 = vector.broadcast %c8_i32_9 : i32 to vector<8x1xi32>
    %17 = arith.cmpi slt, %15, %16 : vector<8x1xi32>
    %18 = arith.extui %17 : vector<8x1xi1> to vector<8x1xi32>
    %19 = arith.sitofp %18 : vector<8x1xi32> to vector<8x1xf32>
    %c0_10 = arith.constant 0 : index
    %c0_11 = arith.constant 0 : index
    %20 = vector.load %arg2[%c0_10, %c0_11] : memref<8x16xbf16, #tpu.memory_space<vmem>>, vector<8x16xbf16>
    %c0_12 = arith.constant 0 : index
    %c0_13 = arith.constant 0 : index
    %21 = vector.load %arg4[%c0_12, %c0_13] : memref<16x32xbf16, #tpu.memory_space<vmem>>, vector<16x32xbf16>
    %cst = arith.constant dense<0.000000e+00> : vector<8x32xf32>
    %22 = tpu.matmul %20, %21, %cst {dimension_numbers = #tpu.dot_dimension_numbers<[1], [0], [0], [1], [0, 0, 1, 1], [], []>} : vector<8x16xbf16>, vector<16x32xbf16>, vector<8x32xf32> -> vector<8x32xf32>
    %23 = vector.broadcast %5 : vector<1x32xf32> to vector<8x32xf32>
    %24 = arith.addf %22, %23 : vector<8x32xf32>
    %cst_14 = arith.constant 0.000000e+00 : f32
    %25 = vector.broadcast %cst_14 : f32 to vector<8x32xf32>
    %26 = arith.maximumf %24, %25 : vector<8x32xf32>
    %c0_i32_15 = arith.constant 0 : i32
    %27 = arith.cmpi eq, %arg0, %c0_i32_15 : i32
    %28 = arith.extui %27 : i1 to i32
    %c0_i32_16 = arith.constant 0 : i32
    %29 = arith.cmpi ne, %28, %c0_i32_16 : i32
    scf.if %29 {
      %33 = vector.broadcast %19 : vector<8x1xf32> to vector<8x32xf32>
      %34 = arith.mulf %33, %26 : vector<8x32xf32>
      %c0_19 = arith.constant 0 : index
      %c0_20 = arith.constant 0 : index
      %35 = vector.load %arg9[%c0_19, %c0_20] : memref<4x32xf32, #tpu.memory_space<vmem>>, vector<1x32xf32>
      %cst_21 = arith.constant dense<0.000000e+00> : vector<32xf32>
      %36 = vector.multi_reduction <add>, %34, %cst_21 [0] : vector<8x32xf32> to vector<32xf32>
      %37 = vector.shape_cast %36 : vector<32xf32> to vector<1x32xf32>
      %38 = arith.addf %35, %37 : vector<1x32xf32>
      %c0_22 = arith.constant 0 : index
      %c0_23 = arith.constant 0 : index
      %39 = vector.load %arg9[%c0_22, %c0_23] : memref<4x32xf32, #tpu.memory_space<vmem>>, vector<1x32xf32>
      tpu.vector_store %arg9[%c0_22, %c0_23], %38 {strides = array<i32>} : memref<4x32xf32, #tpu.memory_space<vmem>>, vector<1x32xf32>,
      %c1_24 = arith.constant 1 : index
      %c0_25 = arith.constant 0 : index
      %40 = vector.load %arg9[%c1_24, %c0_25] : memref<4x32xf32, #tpu.memory_space<vmem>>, vector<1x32xf32>
      %41 = arith.mulf %34, %26 : vector<8x32xf32>
      %cst_26 = arith.constant dense<0.000000e+00> : vector<32xf32>
      %42 = vector.multi_reduction <add>, %41, %cst_26 [0] : vector<8x32xf32> to vector<32xf32>
      %43 = vector.shape_cast %42 : vector<32xf32> to vector<1x32xf32>
      %44 = arith.addf %40, %43 : vector<1x32xf32>
      %c1_27 = arith.constant 1 : index
      %c0_28 = arith.constant 0 : index
      %45 = vector.load %arg9[%c1_27, %c0_28] : memref<4x32xf32, #tpu.memory_space<vmem>>, vector<1x32xf32>
      tpu.vector_store %arg9[%c1_27, %c0_28], %44 {strides = array<i32>} : memref<4x32xf32, #tpu.memory_space<vmem>>, vector<1x32xf32>,
    } else {
    }
    %c1_i32 = arith.constant 1 : i32
    %30 = arith.cmpi sge, %arg0, %c1_i32 : i32
    %31 = arith.extui %30 : i1 to i32
    %cst_17 = arith.constant 1.250000e-01 : f32
    %c0_i32_18 = arith.constant 0 : i32
    %32 = arith.cmpi ne, %31, %c0_i32_18 : i32
    scf.if %32 {
      %c0_19 = arith.constant 0 : index
      %c0_20 = arith.constant 0 : index
      %33 = vector.load %arg9[%c0_19, %c0_20] : memref<4x32xf32, #tpu.memory_space<vmem>>, vector<1x32xf32>
      %34 = vector.broadcast %cst_17 : f32 to vector<1x32xf32>
      %35 = arith.mulf %33, %34 : vector<1x32xf32>
      %c1_21 = arith.constant 1 : index
      %c0_22 = arith.constant 0 : index
      %36 = vector.load %arg9[%c1_21, %c0_22] : memref<4x32xf32, #tpu.memory_space<vmem>>, vector<1x32xf32>
      %37 = vector.broadcast %cst_17 : f32 to vector<1x32xf32>
      %38 = arith.mulf %36, %37 : vector<1x32xf32>
      %39 = arith.mulf %35, %35 : vector<1x32xf32>
      %40 = arith.subf %38, %39 : vector<1x32xf32>
      %cst_23 = arith.constant 0.000000e+00 : f32
      %41 = vector.broadcast %cst_23 : f32 to vector<1x32xf32>
      %42 = arith.maximumf %40, %41 : vector<1x32xf32>
      %43 = vector.broadcast %35 : vector<1x32xf32> to vector<8x32xf32>
      %44 = arith.subf %26, %43 : vector<8x32xf32>
      %cst_24 = arith.constant 9.99999974E-6 : f32
      %45 = vector.broadcast %cst_24 : f32 to vector<1x32xf32>
      %46 = arith.addf %42, %45 : vector<1x32xf32>
      %47 = math.rsqrt %46 : vector<1x32xf32>
      %48 = vector.broadcast %47 : vector<1x32xf32> to vector<8x32xf32>
      %49 = arith.mulf %44, %48 : vector<8x32xf32>
      %50 = vector.broadcast %6 : vector<1x32xf32> to vector<8x32xf32>
      %51 = arith.mulf %49, %50 : vector<8x32xf32>
      %52 = vector.broadcast %7 : vector<1x32xf32> to vector<8x32xf32>
      %53 = arith.addf %51, %52 : vector<8x32xf32>
      %54 = arith.truncf %53 : vector<8x32xf32> to vector<8x32xbf16>
      %c0_25 = arith.constant 0 : index
      %c0_26 = arith.constant 0 : index
      %55 = vector.load %arg5[%c0_25, %c0_26] : memref<32x32xbf16, #tpu.memory_space<vmem>>, vector<32x32xbf16>
      %cst_27 = arith.constant dense<0.000000e+00> : vector<8x32xf32>
      %56 = tpu.matmul %54, %55, %cst_27 {dimension_numbers = #tpu.dot_dimension_numbers<[1], [0], [0], [1], [0, 0, 1, 1], [], []>} : vector<8x32xbf16>, vector<32x32xbf16>, vector<8x32xf32> -> vector<8x32xf32>
      %57 = vector.broadcast %8 : vector<1x32xf32> to vector<8x32xf32>
      %58 = arith.addf %56, %57 : vector<8x32xf32>
      %cst_28 = arith.constant 0.000000e+00 : f32
      %59 = vector.broadcast %cst_28 : f32 to vector<8x32xf32>
      %60 = arith.maximumf %58, %59 : vector<8x32xf32>
      %c1_i32_29 = arith.constant 1 : i32
      %61 = arith.cmpi eq, %arg0, %c1_i32_29 : i32
      %62 = arith.extui %61 : i1 to i32
      %c0_i32_30 = arith.constant 0 : i32
      %63 = arith.cmpi ne, %62, %c0_i32_30 : i32
      scf.if %63 {
        %67 = vector.broadcast %19 : vector<8x1xf32> to vector<8x32xf32>
        %68 = arith.mulf %67, %60 : vector<8x32xf32>
        %c2_32 = arith.constant 2 : index
        %c0_33 = arith.constant 0 : index
        %69 = vector.load %arg9[%c2_32, %c0_33] : memref<4x32xf32, #tpu.memory_space<vmem>>, vector<1x32xf32>
        %cst_34 = arith.constant dense<0.000000e+00> : vector<32xf32>
        %70 = vector.multi_reduction <add>, %68, %cst_34 [0] : vector<8x32xf32> to vector<32xf32>
        %71 = vector.shape_cast %70 : vector<32xf32> to vector<1x32xf32>
        %72 = arith.addf %69, %71 : vector<1x32xf32>
        %c2_35 = arith.constant 2 : index
        %c0_36 = arith.constant 0 : index
        %73 = vector.load %arg9[%c2_35, %c0_36] : memref<4x32xf32, #tpu.memory_space<vmem>>, vector<1x32xf32>
        tpu.vector_store %arg9[%c2_35, %c0_36], %72 {strides = array<i32>} : memref<4x32xf32, #tpu.memory_space<vmem>>, vector<1x32xf32>,
        %c3_37 = arith.constant 3 : index
        %c0_38 = arith.constant 0 : index
        %74 = vector.load %arg9[%c3_37, %c0_38] : memref<4x32xf32, #tpu.memory_space<vmem>>, vector<1x32xf32>
        %75 = arith.mulf %68, %60 : vector<8x32xf32>
        %cst_39 = arith.constant dense<0.000000e+00> : vector<32xf32>
        %76 = vector.multi_reduction <add>, %75, %cst_39 [0] : vector<8x32xf32> to vector<32xf32>
        %77 = vector.shape_cast %76 : vector<32xf32> to vector<1x32xf32>
        %78 = arith.addf %74, %77 : vector<1x32xf32>
        %c3_40 = arith.constant 3 : index
        %c0_41 = arith.constant 0 : index
        %79 = vector.load %arg9[%c3_40, %c0_41] : memref<4x32xf32, #tpu.memory_space<vmem>>, vector<1x32xf32>
        tpu.vector_store %arg9[%c3_40, %c0_41], %78 {strides = array<i32>} : memref<4x32xf32, #tpu.memory_space<vmem>>, vector<1x32xf32>,
      } else {
      }
      %c2_i32 = arith.constant 2 : i32
      %64 = arith.cmpi eq, %arg0, %c2_i32 : i32
      %65 = arith.extui %64 : i1 to i32
      %c0_i32_31 = arith.constant 0 : i32
      %66 = arith.cmpi ne, %65, %c0_i32_31 : i32
      scf.if %66 {
        %c2_32 = arith.constant 2 : index
        %c0_33 = arith.constant 0 : index
        %67 = vector.load %arg9[%c2_32, %c0_33] : memref<4x32xf32, #tpu.memory_space<vmem>>, vector<1x32xf32>
        %68 = vector.broadcast %cst_17 : f32 to vector<1x32xf32>
        %69 = arith.mulf %67, %68 : vector<1x32xf32>
        %c3_34 = arith.constant 3 : index
        %c0_35 = arith.constant 0 : index
        %70 = vector.load %arg9[%c3_34, %c0_35] : memref<4x32xf32, #tpu.memory_space<vmem>>, vector<1x32xf32>
        %71 = vector.broadcast %cst_17 : f32 to vector<1x32xf32>
        %72 = arith.mulf %70, %71 : vector<1x32xf32>
        %73 = arith.mulf %69, %69 : vector<1x32xf32>
        %74 = arith.subf %72, %73 : vector<1x32xf32>
        %cst_36 = arith.constant 0.000000e+00 : f32
        %75 = vector.broadcast %cst_36 : f32 to vector<1x32xf32>
        %76 = arith.maximumf %74, %75 : vector<1x32xf32>
        %77 = vector.broadcast %69 : vector<1x32xf32> to vector<8x32xf32>
        %78 = arith.subf %60, %77 : vector<8x32xf32>
        %cst_37 = arith.constant 9.99999974E-6 : f32
        %79 = vector.broadcast %cst_37 : f32 to vector<1x32xf32>
        %80 = arith.addf %76, %79 : vector<1x32xf32>
        %81 = math.rsqrt %80 : vector<1x32xf32>
        %82 = vector.broadcast %81 : vector<1x32xf32> to vector<8x32xf32>
        %83 = arith.mulf %78, %82 : vector<8x32xf32>
        %84 = vector.broadcast %9 : vector<1x32xf32> to vector<8x32xf32>
        %85 = arith.mulf %83, %84 : vector<8x32xf32>
        %86 = vector.broadcast %10 : vector<1x32xf32> to vector<8x32xf32>
        %87 = arith.addf %85, %86 : vector<8x32xf32>
        %c0_38 = arith.constant 0 : index
        %c0_39 = arith.constant 0 : index
        %88 = vector.load %arg3[%c0_38, %c0_39] : memref<8x32xf32, #tpu.memory_space<vmem>>, vector<8x32xf32>
        %89 = arith.mulf %87, %88 : vector<8x32xf32>
        %90 = arith.truncf %89 : vector<8x32xf32> to vector<8x32xbf16>
        %c0_40 = arith.constant 0 : index
        %c0_41 = arith.constant 0 : index
        %91 = vector.load %arg6[%c0_40, %c0_41] : memref<32x128xbf16, #tpu.memory_space<vmem>>, vector<32x128xbf16>
        %cst_42 = arith.constant dense<0.000000e+00> : vector<8x128xf32>
        %92 = tpu.matmul %90, %91, %cst_42 {dimension_numbers = #tpu.dot_dimension_numbers<[1], [0], [0], [1], [0, 0, 1, 1], [], []>} : vector<8x32xbf16>, vector<32x128xbf16>, vector<8x128xf32> -> vector<8x128xf32>
        %93 = vector.broadcast %11 : vector<1x1xf32> to vector<8x128xf32>
        %94 = arith.addf %92, %93 : vector<8x128xf32>
        %c0_43 = arith.constant 0 : index
        %c0_44 = arith.constant 0 : index
        %95 = vector.load %arg8[%c0_43, %c0_44] : memref<8x128xf32, #tpu.memory_space<vmem>>, vector<8x128xf32>
        tpu.vector_store %arg8[%c0_43, %c0_44], %94 {strides = array<i32>} : memref<8x128xf32, #tpu.memory_space<vmem>>, vector<8x128xf32>,
      } else {
      }
    } else {
    }
    return
  }
  func.func @transform_0(%arg0: i32, %arg1: i32) -> (i32, i32) {
    %c0_i32 = arith.constant 0 : i32
    %c0_i32_0 = arith.constant 0 : i32
    return %arg1, %c0_i32 : i32, i32
  }
  func.func @transform_1(%arg0: i32, %arg1: i32) -> (i32, i32) {
    %c0_i32 = arith.constant 0 : i32
    %c0_i32_0 = arith.constant 0 : i32
    return %arg1, %c0_i32 : i32, i32
  }
  func.func @transform_2(%arg0: i32, %arg1: i32) -> (i32, i32) {
    %c0_i32 = arith.constant 0 : i32
    %c0_i32_0 = arith.constant 0 : i32
    %c0_i32_1 = arith.constant 0 : i32
    return %c0_i32, %c0_i32_0 : i32, i32
  }
  func.func @transform_3(%arg0: i32, %arg1: i32) -> (i32, i32) {
    %c0_i32 = arith.constant 0 : i32
    %c0_i32_0 = arith.constant 0 : i32
    %c0_i32_1 = arith.constant 0 : i32
    return %c0_i32, %c0_i32_0 : i32, i32
  }
  func.func @transform_4(%arg0: i32, %arg1: i32) -> (i32, i32) {
    %c0_i32 = arith.constant 0 : i32
    %c0_i32_0 = arith.constant 0 : i32
    %c0_i32_1 = arith.constant 0 : i32
    return %c0_i32, %c0_i32_0 : i32, i32
  }
  func.func @transform_5(%arg0: i32, %arg1: i32) -> (i32, i32) {
    %c0_i32 = arith.constant 0 : i32
    %c0_i32_0 = arith.constant 0 : i32
    %c0_i32_1 = arith.constant 0 : i32
    return %c0_i32, %c0_i32_0 : i32, i32
  }
  func.func @transform_6(%arg0: i32, %arg1: i32) -> (i32, i32) {
    %c0_i32 = arith.constant 0 : i32
    %c0_i32_0 = arith.constant 0 : i32
    return %arg1, %c0_i32 : i32, i32
  }
}

</mosaic_0001>

<bundles_post_ra>
// kernel: tpu_custom_call.1
= control target key start
LH: loop header
LB: loop body
LE: loop exit
PB: predicated region body
PF: predicated region fallthrough
CT: control target
= control target key end

     0   :  { %11 = vsyncpa [#allocation4], 0  ;;  %s1439_s0 = inlined_call_operand.hbm [shape: bf16[8,16], index: 0, kind: input, shape index: {}]   ;;  %s1440_s1 = inlined_call_operand.hbm [shape: f32[8,32], index: 1, kind: input, shape index: {}]   ;;  %s1441_s2 = inlined_call_operand.hbm [shape: bf16[16,32], index: 2, kind: input, shape index: {}]   ;;  %s1442_s3 = inlined_call_operand.hbm [shape: bf16[32,32], index: 3, kind: input, shape index: {}]   ;;  %s1443_s4 = inlined_call_operand.hbm [shape: bf16[32,128], index: 4, kind: input, shape index: {}]   ;;  %s1444_s5 = inlined_call_operand.vmem [shape: f32[7,32], index: 5, kind: input, shape index: {}]   ;;  %s1445_s6 = inlined_call_operand.hbm [shape: f32[8,128], index: 6, kind: output, shape index: {}]  }
   0x1   :  { %12 = vsyncpa [#allocation7], 0 }
   0x2   :  { %13 = vsyncpa [#allocation10], 0 }
   0x3   :  { %14 = vsyncpa [#allocation5], 0  ;;  %s1179_s21 = smov 0   ;;  %s1181_s22 = smov 0  }
   0x4   :  { %s1183_s23 = smov 0  }
   0x5 LB: > { %s1129_s24 = smov [#allocation6]   ;;  %s754_s26 = sadd.s32 4294967295, %s1127_s23   ;;  %s1127_s23 = sphi %s1183_s23, %s20_s23   ;;  %s1123_s22 = sphi %s1181_s22, %s1457_s22   ;;  %s1119_s21 = sphi %s1179_s21, %s1456_s21  }
   0x6   : > { %s227_s25 = sshll.u32 %s1129_s24, 4  ;;  %p755_p0 = scmp.ge.s32.totalorder %s1127_s23, 1  ;;  %s228_s25 = int_to_ptr.vmem [resolvable:$true] %s227_s25 }
   0x7   : > { %p199_p1 = scmp.lt.s32.totalorder %s1127_s23, 4  ;;  %p1199_p2 = scmp.eq.s32.totalorder %s754_s26, 0 }
   0x8   : > { %s1130_s29 = smov [#allocation9]   ;;  %s32_s8 = sadd.s32 1, %s1123_s22 }
   0x9   : > { %s1449_s27 = scalar_select %p1199_p2, 1, 0 }
   0xa   : > { %p1203_p3 = pnand %p755_p0, %p199_p1  ;;  %s250_s30 = sshll.u32 %s1130_s29, 4  ;;  %s1209_s30 = int_to_ptr.vmem [resolvable:$true] %s250_s30 }
   0xb   : > { %s923_s11 = scalar_lea.hbm %s1440_s1, 128 }
   0xc   : > { %s1450_s28 = scalar_select %p1203_p3, 1, 0 }
   0xd   : > { %p847_p4 = pneg %p1203_p3  ;;  %p924_p6 = scmp.ne.s32.totalorder %s1440_s1, %s923_s11 }
   0xe   : > { %p930_p10 = scmp.lt.u32.totalorder %s923_s11, %s1440_s1 }
   0xf   : > { %p1213_p5 = pnand %p1199_p2, %p847_p4 }
  0x11   : > { %p1226_p7 = pneg %p1213_p5 }
  0x13   : > { %p926_p8 = pnand %p1226_p7, %p924_p6 }
  0x15   : > { %p927_p9 = pneg %p926_p8 }
  0x17   : > { %p932_p11 = pnand %p930_p10, %p927_p9 }
  0x19   : > { %935 = shalt.err (!%p932_p11)
}
  0x1a   : > { %s936_s17 = scalar_lea.vmem %s228_s25, 128  ;;  %p944_p1 = scmp.lt.s32.totalorder %s228_s25, %s228_s25 }
  0x1b   : > { %p937_p12 = scmp.ne.s32.totalorder %s228_s25, %s936_s17  ;;  %p945_p4 = scmp.lt.s32.totalorder %s936_s17, %s936_s17 }
  0x1d   : > { %p939_p13 = pnand %p937_p12, %p1226_p7  ;;  %p946_p2 = por %p945_p4, %p944_p1 }
  0x1f   : > { %p940_p0 = pneg %p939_p13 }
  0x21   : > { %p947_p3 = pnand %p946_p2, %p940_p0 }
  0x23   : > { %950 = shalt.err (!%p947_p3)
}
  0x24   : > { %853 = dma.hbm_to_vmem [thread:$0]  (!%p1213_p5), %s1440_s1, 128, %s228_s25, [#allocation7]  }
  0x25   : > { %s951_s29 = scalar_lea.hbm %s1442_s3, 256 }
  0x26   : > { %p952_p6 = scmp.ne.s32.totalorder %s1442_s3, %s951_s29  ;;  %p958_p2 = scmp.lt.u32.totalorder %s951_s29, %s1442_s3 }
  0x28   : > { %p954_p8 = pnand %p952_p6, %p1226_p7 }
  0x2a   : > { %p955_p9 = pneg %p954_p8 }
  0x2c   : > { %p960_p3 = pnand %p958_p2, %p955_p9 }
  0x2e   : > { %963 = shalt.err (!%p960_p3)
}
  0x2f   : > { %s964_s25 = scalar_lea.vmem %s1209_s30, 256  ;;  %p972_p13 = scmp.lt.s32.totalorder %s1209_s30, %s1209_s30 }
  0x30   : > { %p965_p10 = scmp.ne.s32.totalorder %s1209_s30, %s964_s25  ;;  %p973_p0 = scmp.lt.s32.totalorder %s964_s25, %s964_s25 }
  0x32   : > { %p967_p11 = pnand %p965_p10, %p1226_p7  ;;  %p974_p1 = por %p973_p0, %p972_p13 }
  0x34   : > { %p968_p12 = pneg %p967_p11 }
  0x36   : > { %p975_p4 = pnand %p974_p1, %p968_p12 }
  0x38   : > { %978 = shalt.err (!%p975_p4)
}
  0x39   : > { %s1131_s13 = smov 64   ;;  %s1132_s15 = smov 4  }
  0x3a   : > { %859 = dma.hbm_to_vmem [thread:$0]  (!%p1213_p5), %s1442_s3, 256, %s1209_s30, [#allocation10], %s1131_s13, %s1131_s13, %s1132_s15  }
  0x3b   : > { %p34_p6 = scmp.ge.s32.totalorder %s32_s8, 3  ;;  %s1133_s18 = smov [#allocation3]  }
  0x3c   : > { %s214_s19 = sshll.u32 %s1133_s18, 4  ;;  %s1134_s20 = smov [#allocation8]   ;;  %s215_s19 = int_to_ptr.vmem [resolvable:$true] %s214_s19 }
  0x3d   : > { %s1459_s8 = smov (%p34_p6, %s32_s8), 0  ;;  %s237_s24 = sshll.u32 %s1134_s20, 4  ;;  %s238_s24 = int_to_ptr.vmem [resolvable:$true] %s237_s24 }
  0x3e   : > { %s979_s10 = scalar_lea.hbm %s1439_s0, 64 }
  0x3f   : > { %p980_p8 = scmp.ne.s32.totalorder %s1439_s0, %s979_s10  ;;  %p986_p3 = scmp.lt.u32.totalorder %s979_s10, %s1439_s0 }
  0x41   : > { %p982_p9 = pnand %p980_p8, %p1226_p7 }
  0x43   : > { %p983_p2 = pneg %p982_p9 }
  0x45   : > { %p988_p10 = pnand %p986_p3, %p983_p2 }
  0x47   : > { %991 = shalt.err (!%p988_p10)
}
  0x48   : > { %s992_s16 = scalar_lea.vmem %s215_s19, 64  ;;  %p1000_p0 = scmp.lt.s32.totalorder %s215_s19, %s215_s19 }
  0x49   : > { %p993_p11 = scmp.ne.s32.totalorder %s215_s19, %s992_s16  ;;  %p1001_p1 = scmp.lt.s32.totalorder %s992_s16, %s992_s16 }
  0x4b   : > { %p995_p12 = pnand %p993_p11, %p1226_p7  ;;  %p1002_p4 = por %p1001_p1, %p1000_p0 }
  0x4d   : > { %p996_p13 = pneg %p995_p12 }
  0x4f   : > { %p1003_p6 = pnand %p1002_p4, %p996_p13 }
  0x51   : > { %1006 = shalt.err (!%p1003_p6)
}
  0x52   : > { %850 = dma.hbm_to_vmem [thread:$0]  (!%p1213_p5), %s1439_s0, 64, %s215_s19, [#allocation4]  }
  0x53   : > { %s1007_s9 = scalar_lea.hbm %s1441_s2, 128 }
  0x54   : > { %p1008_p8 = scmp.ne.s32.totalorder %s1441_s2, %s1007_s9  ;;  %p1014_p3 = scmp.lt.u32.totalorder %s1007_s9, %s1441_s2 }
  0x56   : > { %p1010_p9 = pnand %p1008_p8, %p1226_p7 }
  0x58   : > { %p1011_p2 = pneg %p1010_p9 }
  0x5a   : > { %p1016_p10 = pnand %p1014_p3, %p1011_p2 }
  0x5c   : > { %1019 = shalt.err (!%p1016_p10)
}
  0x5d   : > { %s1020_s25 = scalar_lea.vmem %s238_s24, 128  ;;  %p1028_p0 = scmp.lt.s32.totalorder %s238_s24, %s238_s24 }
  0x5e   : > { %p1021_p11 = scmp.ne.s32.totalorder %s238_s24, %s1020_s25  ;;  %p1029_p1 = scmp.lt.s32.totalorder %s1020_s25, %s1020_s25 }
  0x60   : > { %p1023_p12 = pnand %p1021_p11, %p1226_p7  ;;  %p1030_p4 = por %p1029_p1, %p1028_p0 }
  0x62   : > { %p1024_p13 = pneg %p1023_p12 }
  0x64   : > { %p1031_p6 = pnand %p1030_p4, %p1024_p13 }
  0x66   : > { %1034 = shalt.err (!%p1031_p6)
}
  0x67   : > { %856 = dma.hbm_to_vmem [thread:$0]  (!%p1213_p5), %s1441_s2, 128, %s238_s24, [#allocation7], %s1131_s13, %s1131_s13, %s1132_s15  }
  0x68   : > { %s1135_s17 = smov [#allocation11]   ;;  %s1035_s9 = scalar_lea.hbm %s1443_s4, 256 }
  0x69   : > { %s263_s18 = sshll.u32 %s1135_s17, 4  ;;  %p1036_p8 = scmp.ne.s32.totalorder %s1443_s4, %s1035_s9  ;;  %s264_s18 = int_to_ptr.vmem [resolvable:$true] %s263_s18 }
  0x6a   : > { %p1042_p3 = scmp.lt.u32.totalorder %s1035_s9, %s1443_s4 }
  0x6b   : > { %p1038_p9 = pnand %p1036_p8, %p1226_p7 }
  0x6d   : > { %p1039_p2 = pneg %p1038_p9 }
  0x6f   : > { %p1044_p10 = pnand %p1042_p3, %p1039_p2 }
  0x71   : > { %1047 = shalt.err (!%p1044_p10)
}
  0x72   : > { %s1048_s24 = scalar_lea.vmem %s264_s18, 256  ;;  %p1056_p0 = scmp.lt.s32.totalorder %s264_s18, %s264_s18 }
  0x73   : > { %p1049_p11 = scmp.ne.s32.totalorder %s264_s18, %s1048_s24  ;;  %p1057_p1 = scmp.lt.s32.totalorder %s1048_s24, %s1048_s24 }
  0x75   : > { %p1051_p12 = pnand %p1049_p11, %p1226_p7  ;;  %p1058_p4 = por %p1057_p1, %p1056_p0 }
  0x77   : > { %p1052_p13 = pneg %p1051_p12 }
  0x79   : > { %p1059_p6 = pnand %p1058_p4, %p1052_p13 }
  0x7b   : > { %1062 = shalt.err (!%p1059_p6)
}
  0x7c   : > { %862 = dma.hbm_to_vmem [thread:$0]  (!%p1213_p5), %s1443_s4, 256, %s264_s18, [#allocation10], %s1131_s13, %s1131_s13, %s1132_s15  }
  0x7d   : > { %p1453_p8 = scmp.ne.s32.totalorder %s1450_s28, 0 }
  0x7e   : > { %p1454_p7 = scmp.ne.s32.totalorder (!%p1453_p8), %s1449_s27, 0 }
  0x7f   : > { %282 = sbr.rel (%p1453_p8) target bundleno = 937 (0x3a9), region = 44 }
  0x86   : > { %1102 = dma.done.wait (%p1454_p7), [#allocation4], 64  }
  0x87   : > { %1104 = vsyncadd (%p1454_p7), [#allocation4], 4294967232 }
  0x88   : > { %1106 = dma.done.wait (%p1454_p7), [#allocation7], 256  }
  0x89   : > { %1108 = vsyncadd (%p1454_p7), [#allocation7], 4294967040 }
  0x8a   : > { %1110 = dma.done.wait (%p1454_p7), [#allocation10], 512  }
  0x8b   : > { %1112 = vsyncadd (%p1454_p7), [#allocation10], 4294966784  ;;  %p319_p5 = scmp.eq.s32.totalorder %s1119_s21, 0 }
  0x8c   : > { %vm325_vm0 = vcmask (%p319_p5), 257024   ;;  %v1136_v0 = vmov (%p319_p5), 0.0  }
  0x8d   : > { %324 = sbr.rel (!%p319_p5) target bundleno = 148 (0x94), region = 68  ;;  %326 = vst.msk [vmem:[#allocation2] sm:$0xf] (%p319_p5), %vm325_vm0, %v1136_v0 }
  0x94 PF: > { %v1352_v1 = vld [vmem:[%s1444_s5 + $0x1] ss:$0 sm:$0xff]  ;;  %v1357_v2 = vld [vmem:[%s1444_s5 + $0x2] ss:$0 sm:$0xff]  ;;  %v1362_v3 = vld [vmem:[%s1444_s5 + $0x3] ss:$0 sm:$0xff] }
  0x95   : > { %v1367_v4 = vld [vmem:[%s1444_s5 + $0x4] ss:$0 sm:$0xff]  ;;  %v1372_v5 = vld [vmem:[%s1444_s5 + $0x5] ss:$0 sm:$0xff]  ;;  %v1377_v6 = vld [vmem:[%s1444_s5 + $0x6] sm:$0x1] }
  0x96   : > { %v914_v7 = vld [vmem:[#allocation8] sm:$0xff]   ;;  %v1137_v8 = vmov 0.0   ;;  %vm1138_vm1 = vmmov 0   ;;  %v342_v9 = vld [vmem:[#allocation3] sm:$0xf]  ;;  %vm355_vm2 = vcmask 130048  }
  0x97   : > { %799 = vmatprep.subr.bf16.mxu0 %v1137_v8  ;;  %801 = vmatprep.mubr.msk.bf16.mxu0 %vm1138_vm1, %v1137_v8  ;;  %v768_v10 = vld [vmem:[%s1444_s5] ss:$0 sm:$0xff]  ;;  %p771_p9 = scmp.ne.s32.totalorder %s1119_s21, 0 }
  0x98   : > { %800 = vmatpush3.bf16.msra.mxu0 %v914_v7  ;;  %vm405_vm3 = vcmask (!%p771_p9), 261120   ;;  %v404_v29 = vld [vmem:[#allocation2] sm:$0x1] (!%p771_p9)  ;;  %v416_v32 = vld [vmem:[#allocation2 + $0x1] sm:$0x1] (!%p771_p9)  ;;  %vm414_vm4 = vcmask (!%p771_p9), 253952  }
  0x9b   : > { %802 = vmatmul.mubr.msk.bf16.vlgmr.msra.gmra.mrb[0].mxu0 %vm355_vm2, %v342_v9 }
 0x16b   : > { %402 = sbr.rel (%p771_p9) target bundleno = 389 (0x185), region = 72 }
 0x16e   : > { %v393_v11 = vpop.f32.mrb[0].mxu0 }
 0x16f   : > { %v394_v12 = vadd.f32 %v768_v10, %v393_v11  ;;  %v803_v13 = vpop.f32.mrb[1].mxu0 }
 0x170   : > { %v396_v14 = vpop.f32.mrb[2].mxu0 }
 0x171   : > { %v399_v15 = vmax.f32 %v394_v12, 0.0  ;;  %v804_v16 = vpop.f32.mrb[3].mxu0 }
 0x173   : > { %v417_v17 = vmul.f32 %v399_v15, %v399_v15  ;;  %v406_v18 = vsel %vm405_vm3, %v399_v15, 0.0 }
 0x174   : > { %v407_v19 = vrot.slane %v406_v18, 4 }
 0x175   : > { %v418_v20 = vsel %vm405_vm3, %v417_v17, 0.0 }
 0x176   : > { %v419_v21 = vrot.slane %v418_v20, 4  ;;  %v408_v22 = vadd.f32 %v407_v19, %v406_v18 }
 0x178   : > { %v420_v23 = vadd.f32 %v419_v21, %v418_v20  ;;  %v409_v24 = vrot.slane %v408_v22, 2 }
 0x17a   : > { %v421_v25 = vrot.slane %v420_v23, 2  ;;  %v410_v26 = vadd.f32 %v409_v24, %v408_v22 }
 0x17c   : > { %v422_v27 = vadd.f32 %v421_v25, %v420_v23  ;;  %v411_v28 = vrot.slane %v410_v26, 1 }
 0x17e   : > { %v423_v30 = vrot.slane %v422_v27, 1  ;;  %v412_v31 = vadd.f32 %v411_v28, %v410_v26 }
 0x180   : > { %v424_v33 = vadd.f32 %v423_v30, %v422_v27  ;;  %v413_v34 = vadd.f32 %v412_v31, %v404_v29 }
 0x182   : > { %v425_v35 = vadd.f32 %v424_v33, %v416_v32  ;;  %415 = vst.msk [vmem:[#allocation2] sm:$0x1] %vm414_vm4, %v413_v34 }
 0x184   : > { %426 = vst.msk [vmem:[#allocation2 + $0x1] sm:$0x1] %vm414_vm4, %v425_v35 }
 0x185 PF: > { %p772_p2 = scmp.lt.s32.totalorder %s1119_s21, 1 }
 0x186   : > { %v915_v36 = vld [vmem:[#allocation9] sm:$0xff] (!%p772_p2)   ;;  %v1139_v37 = vmov (!%p772_p2), 0.0   ;;  %v916_v38 = vld [vmem:[#allocation9 + $0x8] sm:$0xff] (!%p772_p2)   ;;  %vm1140_vm5 = vmmov (!%p772_p2), 0   ;;  %v438_v44 = vlaneseq (!%p772_p2)  ;;  %vm481_vm6 = vcmask (!%p772_p2), 261120   ;;  %p779_p3 = scmp.ne.s32.totalorder (!%p772_p2), %s1119_s21, 1 }
 0x187   : > { %430 = sbr.rel (%p772_p2) target bundleno = 912 (0x390), region = 76  ;;  %805 = vmatprep.subr.bf16.mxu0 (!%p772_p2), %v1139_v37  ;;  %809 = vmatprep.mubr.msk.bf16.mxu0 (!%p772_p2), %vm1140_vm5, %v1139_v37 }
 0x188   : > { %806 = vmatpush3.bf16.msra.mxu0 (!%p772_p2), %v915_v36  ;;  %v439_v47 = vshrl.u32 (!%p772_p2), %v438_v44, 7 }
 0x189   : > { %v431_v39 = vld [vmem:[#allocation2] sm:$0x1] (!%p772_p2)  ;;  %807 = vmatprep.subr.bf16.mxu0 (!%p772_p2), %v1139_v37 }
 0x18a   : > { %v432_v41 = vmul.f32 (!%p772_p2), 0.125, %v431_v39  ;;  %v1384_v49 = vsub.s32 (!%p772_p2), 0, %v439_v47 }
 0x18b   : > { %v433_v40 = vld [vmem:[#allocation2 + $0x1] sm:$0x1] (!%p772_p2) }
 0x18c   : > { %v434_v42 = vmul.f32 (!%p772_p2), 0.125, %v433_v40  ;;  %v435_v43 = vmul.f32 (!%p772_p2), %v432_v41, %v432_v41  ;;  %808 = vmatpush3.bf16.msra.mxu0 (!%p772_p2), %v916_v38  ;;  %v441_v50 = vrot.slane (!%p772_p2), %v432_v41, %v1384_v49 }
 0x18e   : > { %v436_v45 = vsub.f32 %v434_v42, %v435_v43  ;;  %v442_v51 = vsub.f32 %v399_v15, %v441_v50  ;;  %v531_v15 = vld [vmem:[#allocation2 + $0x2] sm:$0x1] (!%p779_p3)  ;;  %vm540_vm7 = vcmask (!%p779_p3), 253952   ;;  %v542_v18 = vld [vmem:[#allocation2 + $0x3] sm:$0x1] (!%p779_p3) }
 0x190   : > { %v437_v46 = vmax.f32 %v436_v45, 0.0 }
 0x192   : > { %v443_v48 = vadd.f32 1e-05, %v437_v46 }
 0x194   : > { %917 = vrsqrt.f32 %v443_v48 }
 0x19e   : > { %v918_v52 = vpop.eup %917 }
 0x19f   : > { %v448_v53 = vrot.slane %v918_v52, %v1384_v49 }
 0x1a1   : > { %v449_v54 = vmul.f32 %v448_v53, %v442_v51 }
 0x1a3   : > { %v454_v55 = vmul.f32 %v1352_v1, %v449_v54 }
 0x1a5   : > { %v459_v56 = vadd.f32 %v1357_v2, %v454_v55 }
 0x1a7   : > { %v460_v57 = vpack.c.bf16 %v459_v56, %v459_v56 }
 0x1a9   : > { %810 = vmatmul.mubr.msk.bf16.vlgmr.msra.gmra.mrb[0].mxu0 %vm481_vm6, %v460_v57 }
 0x279   : > { %529 = sbr.rel (%p779_p3) target bundleno = 659 (0x293), region = 80 }
 0x27c   : > { %v519_v58 = vpop.f32.mrb[0].mxu0 }
 0x27d   : > { %v520_v59 = vadd.f32 %v1362_v3, %v519_v58  ;;  %v811_v60 = vpop.f32.mrb[1].mxu0 }
 0x27e   : > { %v522_v61 = vpop.f32.mrb[2].mxu0 }
 0x27f   : > { %v525_v62 = vmax.f32 %v520_v59, 0.0  ;;  %v812_v63 = vpop.f32.mrb[3].mxu0 }
 0x281   : > { %v532_v0 = vsel %vm481_vm6, %v525_v62, 0.0  ;;  %v543_v7 = vmul.f32 %v525_v62, %v525_v62 }
 0x282   : > { %v533_v1 = vrot.slane %v532_v0, 4 }
 0x283   : > { %v544_v2 = vsel %vm481_vm6, %v543_v7, 0.0 }
 0x284   : > { %v534_v8 = vadd.f32 %v533_v1, %v532_v0  ;;  %v545_v9 = vrot.slane %v544_v2, 4 }
 0x286   : > { %v535_v10 = vrot.slane %v534_v8, 2  ;;  %v546_v11 = vadd.f32 %v545_v9, %v544_v2 }
 0x288   : > { %v536_v12 = vadd.f32 %v535_v10, %v534_v8  ;;  %v547_v13 = vrot.slane %v546_v11, 2 }
 0x28a   : > { %v537_v3 = vrot.slane %v536_v12, 1  ;;  %v548_v14 = vadd.f32 %v547_v13, %v546_v11 }
 0x28c   : > { %v538_v16 = vadd.f32 %v537_v3, %v536_v12  ;;  %v549_v17 = vrot.slane %v548_v14, 1 }
 0x28e   : > { %v539_v19 = vadd.f32 %v538_v16, %v531_v15  ;;  %v550_v20 = vadd.f32 %v549_v17, %v548_v14 }
 0x290   : > { %541 = vst.msk [vmem:[#allocation2 + $0x2] sm:$0x1] %vm540_vm7, %v539_v19  ;;  %v551_v21 = vadd.f32 %v550_v20, %v542_v18 }
 0x292   : > { %552 = vst.msk [vmem:[#allocation2 + $0x3] sm:$0x1] %vm540_vm7, %v551_v21 }
 0x293 PF: > { %p780_p10 = scmp.ne.s32.totalorder %s1119_s21, 2 }
 0x294   : > { %v919_v22 = vld [vmem:[#allocation11] sm:$0xff] (!%p780_p10)   ;;  %821 = vpush (!%p780_p10), %v1377_v6  ;;  %v1141_v23 = vmov (!%p780_p10), 0.0   ;;  %v920_v24 = vld [vmem:[#allocation11 + $0x8] sm:$0xff] (!%p780_p10)   ;;  %vm1142_vm8 = vmmov (!%p780_p10), 0  }
 0x295   : > { %556 = sbr.rel (%p780_p10) target bundleno = 912 (0x390), region = 84  ;;  %813 = vmatprep.subr.bf16.mxu0 (!%p780_p10), %v1141_v23  ;;  %817 = vmatprep.mubr.msk.bf16.mxu0 (!%p780_p10), %vm1142_vm8, %v1141_v23  ;;  %v586_v38 = vld [vmem:[#allocation6] sm:$0xff] (!%p780_p10) }
 0x296   : > { %814 = vmatpush3.bf16.msra.mxu0 (!%p780_p10), %v919_v22 }
 0x297   : > { %v557_v25 = vld [vmem:[#allocation2 + $0x2] sm:$0x1] (!%p780_p10)  ;;  %815 = vmatprep.subr.bf16.mxu0 (!%p780_p10), %v1141_v23 }
 0x298   : > { %v558_v27 = vmul.f32 (!%p780_p10), 0.125, %v557_v25 }
 0x299   : > { %v559_v26 = vld [vmem:[#allocation2 + $0x3] sm:$0x1] (!%p780_p10) }
 0x29a   : > { %v560_v28 = vmul.f32 (!%p780_p10), 0.125, %v559_v26  ;;  %v561_v29 = vmul.f32 (!%p780_p10), %v558_v27, %v558_v27  ;;  %816 = vmatpush3.bf16.msra.mxu0 (!%p780_p10), %v920_v24  ;;  %v567_v33 = vrot.slane (!%p780_p10), %v558_v27, %v1384_v49 }
 0x29c   : > { %v562_v30 = vsub.f32 %v560_v28, %v561_v29  ;;  %v568_v6 = vsub.f32 %v525_v62, %v567_v33 }
 0x29e   : > { %v563_v31 = vmax.f32 %v562_v30, 0.0 }
 0x2a0   : > { %v569_v32 = vadd.f32 1e-05, %v563_v31 }
 0x2a2   : > { %921 = vrsqrt.f32 %v569_v32 }
 0x2ac   : > { %v922_v34 = vpop.eup %921 }
 0x2ad   : > { %v574_v35 = vrot.slane %v922_v34, %v1384_v49 }
 0x2af   : > { %v575_v36 = vmul.f32 %v574_v35, %v568_v6 }
 0x2b1   : > { %v580_v37 = vmul.f32 %v1367_v4, %v575_v36 }
 0x2b3   : > { %v585_v39 = vadd.f32 %v1372_v5, %v580_v37 }
 0x2b5   : > { %v587_v40 = vmul.f32 %v586_v38, %v585_v39 }
 0x2b7   : > { %v588_v41 = vpack.c.bf16 %v587_v40, %v587_v40 }
 0x2b9   : > { %818 = vmatmul.mubr.msk.bf16.vlgmr.msra.gmra.mrb[0].mxu0 %vm481_vm6, %v588_v41 }
 0x2c5   : > { %s822_s21 = spop %821 }
 0x2c6   : > { %v595_v42 = vstv %s822_s21 }
 0x38c   : > { %v646_v43 = vpop.f32.mrb[0].mxu0 }
 0x38d   : > { %v647_v44 = vadd.f32 %v646_v43, %v595_v42  ;;  %v819_v45 = vpop.f32.mrb[1].mxu0 }
 0x38e   : > { %v649_v46 = vpop.f32.mrb[2].mxu0 }
 0x38f   : > { %652 = vst [vmem:[#allocation12] sm:$0xff] %v647_v44  ;;  %v820_v47 = vpop.f32.mrb[3].mxu0 }
 0x390 PF: > { %p1404_p11 = scmp.eq.s32.totalorder %s754_s26, 2  ;;  %s1143_s30 = smov [#allocation12]  }
 0x391   : > { %s662_s24 = sshll.u32 %s1143_s30, 4  ;;  %s663_s24 = int_to_ptr.vmem [resolvable:$true] %s662_s24 }
 0x392   : > { %s1063_s25 = scalar_lea.vmem %s663_s24, 128  ;;  %p1070_p1 = scmp.lt.s32.totalorder %s663_s24, %s663_s24 }
 0x393   : > { %p1064_p12 = scmp.ne.s32.totalorder %s663_s24, %s1063_s25  ;;  %p1071_p4 = scmp.lt.s32.totalorder %s1063_s25, %s1063_s25 }
 0x395   : > { %p1065_p13 = pnand %p1064_p12, %p1404_p11  ;;  %p1072_p6 = por %p1071_p4, %p1070_p1 }
 0x397   : > { %p1066_p0 = pneg %p1065_p13 }
 0x399   : > { %p1073_p8 = pnand %p1072_p6, %p1066_p0 }
 0x39b   : > { %1076 = shalt.err (!%p1073_p8)
}
 0x39c   : > { %s1077_s26 = scalar_lea.hbm %s1445_s6, 128 }
 0x39d   : > { %p1078_p7 = scmp.ne.s32.totalorder %s1445_s6, %s1077_s26  ;;  %p1083_p2 = scmp.lt.u32.totalorder %s1077_s26, %s1445_s6 }
 0x39f   : > { %p1079_p5 = pnand %p1078_p7, %p1404_p11 }
 0x3a1   : > { %p1080_p9 = pneg %p1079_p5 }
 0x3a3   : > { %p1085_p3 = pnand %p1083_p2, %p1080_p9 }
 0x3a5   : > { %1088 = shalt.err (!%p1085_p3)
}
 0x3a6   : > { %844 = dma.vmem_to_hbm [thread:$0]  (%p1404_p11), %s663_s24, 128, %s1445_s6, [#allocation5]  }
 0x3a7   : > { %1114 = dma.done.wait (%p1404_p11), [#allocation5], 128  }
 0x3a8   : > { %1116 = vsyncadd (%p1404_p11), [#allocation5], 4294967168 }
 0x3a9 PF: > { %s20_s23 = sadd.s32 1, %s1127_s23   ;;  %s1456_s21 = smov %s1123_s22 }
 0x3aa   : > { %p17_p10 = scmp.ge.s32.totalorder %s20_s23, 5   ;;  %s1457_s22 = smov %s1459_s8 }
 0x3ac   :  { %19 = sbr.rel (!%p17_p10) target bundleno = 5 (0x5), region = 112 }
 0x3b3   :  { %675 = vsyncpa [#allocation4], 1 }
 0x3b4   :  { %677 = vsyncpa [#allocation4 + $0x1], 1 }
 0x3b5   :  { %678 = vsyncpa [#allocation7], 1 }
 0x3b6   :  { %679 = vsyncpa [#allocation10], 1 }
 0x3b7   :  { %680 = vsyncpa [#allocation5], 1 }
 0x3b8   :  { %682 = vsyncpa [#allocation5 + $0x1], 1 }

</bundles_post_ra>
